<compile_context>
chip_gen: v7x
topology: tpu7x:2x2x1
jax: 0.10.0
libtpu: 0.0.40
codegen_flags: <defaults>
</compile_context>

<pallas_src>
import jax
import jax.numpy as jnp
from jax.experimental import pallas as pl
from jax.experimental.pallas import tpu as pltpu


def _round_up(a, b):
    return ((a + b - 1) // b) * b


def iclassifier_kernel(x_ref, wf_ref, bf_ref, wc_ref, bc_ref,
                       feats_ref, c_ref, acc_ref):
    """Grid point (i, k): instance tile i, reduction chunk k.

    x_ref     : (tile_n, tile_k) bf16   instance tile, K chunk
    wf_ref    : (tile_k, F)      bf16   feature_extractor Linear chunk (pre-transposed)
    bf_ref    : (1, F)           f32    feature_extractor bias
    wc_ref    : (F, C_pad)       bf16   fc Linear (pre-transposed, lane-padded)
    bc_ref    : (1, C_pad)       f32    fc bias (lane-padded)
    feats_ref : (tile_n, F)      f32    output features (flattened view)
    c_ref     : (tile_n, C_pad)  f32    output class scores (lane-padded)
    acc_ref   : (tile_n, F)      f32    VMEM accumulator across K chunks
    """
    k = pl.program_id(1)

    @pl.when(k == 0)
    def _init():
        acc_ref[...] = jnp.zeros_like(acc_ref)

    # feature_extractor: partial Linear(in_dim, F) over this K chunk, f32 acc.
    acc_ref[...] += jnp.dot(x_ref[...], wf_ref[...],
                            preferred_element_type=jnp.float32)

    @pl.when(k == pl.num_programs(1) - 1)
    def _finalize():
        # bias + ReLU in f32, then emit feats and the classifier head.
        feats = jnp.maximum(acc_ref[...] + bf_ref[...], 0.0)
        feats_ref[...] = feats.astype(feats_ref.dtype)
        c = jnp.dot(feats.astype(wc_ref.dtype), wc_ref[...],
                    preferred_element_type=jnp.float32) + bc_ref[...]
        c_ref[...] = c.astype(c_ref.dtype)


def iclassifier_forward(x, params, *, tile_n=256, tile_k=512):
    """x: (N, C, H, W) (or any (N, ...)).

    Returns (feats (N, F), c (N, num_classes)) — same as the PyTorch module.
    """
    wf, bf, wc, bc = params["wf"], params["bf"], params["wc"], params["bc"]
    N = x.shape[0]
    x2d = x.reshape(N, -1).astype(jnp.bfloat16)          # flatten + bf16 stream
    in_dim = x2d.shape[1]
    F = wf.shape[1]
    C = wc.shape[1]

    # ---- classifier head lane padding: C -> multiple of 128 (lane-dense vst) --
    C_pad = _round_up(C, 128)
    if C_pad != C:
        wc = jnp.pad(wc, ((0, 0), (0, C_pad - C)))
        bc = jnp.pad(bc, ((0, 0), (0, C_pad - C)))

    # ---- instance (M) tile: multiple of 16 for bf16 sublane packing ----------
    if N >= 16:
        tile_n = max(16, min((tile_n // 16) * 16, (N // 16) * 16))
    else:
        tile_n = N                      # single block equal to the full dim
    grid_n = pl.cdiv(N, tile_n)         # ragged last tile handled by edge masking

    # ---- reduction (K) tile over in_dim --------------------------------------
    if in_dim <= tile_k:
        tile_k = in_dim                 # single full-dim K block, no padding
        k_pad = in_dim
    else:
        tile_k = max(128, (tile_k // 128) * 128)
        k_pad = _round_up(in_dim, tile_k)
    if k_pad != in_dim:
        # Zero padding along K is numerically exact (extra HBM pass; avoided
        # whenever in_dim is already a multiple of tile_k).
        x2d = jnp.pad(x2d, ((0, 0), (0, k_pad - in_dim)))
        wf = jnp.pad(wf, ((0, k_pad - in_dim), (0, 0)))
    grid_k = k_pad // tile_k

    grid = (grid_n, grid_k)

    in_specs = [
        pl.BlockSpec((tile_n, tile_k), lambda i, k: (i, k)),   # x tiles (streamed)
        pl.BlockSpec((tile_k, F),      lambda i, k: (k, 0)),   # wf chunks (streamed over K)
        pl.BlockSpec((1, F),           lambda i, k: (0, 0)),   # bf  (VMEM-resident)
        pl.BlockSpec((F, C_pad),       lambda i, k: (0, 0)),   # wc  (VMEM-resident)
        pl.BlockSpec((1, C_pad),       lambda i, k: (0, 0)),   # bc  (VMEM-resident)
    ]
    out_specs = (
        pl.BlockSpec((tile_n, F),     lambda i, k: (i, 0)),    # feats (lane-dense if F%128==0)
        pl.BlockSpec((tile_n, C_pad), lambda i, k: (i, 0)),    # class scores (lane-dense)
    )
    out_shape = (
        jax.ShapeDtypeStruct((N, F), jnp.float32),
        jax.ShapeDtypeStruct((N, C_pad), jnp.float32),
    )

    # ---- explicit VMEM budget (double-buffered pipeline + accumulator) -------
    budget = (
        2 * tile_n * tile_k * 2       # x blocks (bf16)
        + 2 * tile_k * F * 2          # wf blocks (bf16)
        + 2 * F * 4                   # bf
        + 2 * F * C_pad * 2           # wc (bf16)
        + 2 * C_pad * 4               # bc
        + 2 * tile_n * F * 4          # feats out blocks
        + 2 * tile_n * C_pad * 4      # c out blocks
        + tile_n * F * 4              # f32 accumulator scratch
    )
    vmem_limit = min(64 * 1024 * 1024, max(32 * 1024 * 1024, int(budget * 1.5)))

    feats, c_padded = pl.pallas_call(
        iclassifier_kernel,
        grid=grid,
        in_specs=in_specs,
        out_specs=out_specs,
        out_shape=out_shape,
        scratch_shapes=[pltpu.VMEM((tile_n, F), jnp.float32)],
        compiler_params=pltpu.CompilerParams(
            dimension_semantics=("parallel", "arbitrary"),  # N tiles megacore-shardable
            vmem_limit_bytes=vmem_limit,
        ),
    )(x2d, wf, bf, wc, bc)

    c = c_padded[:, :C] if C_pad != C else c_padded
    return feats, c


def init_params(key, in_dim, feature_size, output_class):
    """PyTorch-Linear-style init: U(-1/sqrt(fan_in), 1/sqrt(fan_in)).
    Weights stored pre-transposed as (in_features, out_features); matmul weights
    kept in bf16 (f32 MXU accumulation), biases in f32."""
    def linear(k, fan_in, fan_out):
        kw, kb = jax.random.split(k)
        bound = 1.0 / jnp.sqrt(jnp.float32(fan_in))
        w = jax.random.uniform(kw, (fan_in, fan_out), jnp.float32, -bound, bound)
        b = jax.random.uniform(kb, (1, fan_out), jnp.float32, -bound, bound)
        return w.astype(jnp.bfloat16), b

    k1, k2 = jax.random.split(key)
    wf, bf = linear(k1, in_dim, feature_size)
    wc, bc = linear(k2, feature_size, output_class)
    return dict(wf=wf, bf=bf, wc=wc, bc=bc)


def reference_forward(x, p):
    """Pure-JAX reference mirroring the kernel's numerics (bf16 inputs, f32 acc)."""
    N = x.shape[0]
    x2d = x.reshape(N, -1).astype(jnp.bfloat16)
    feats = jnp.maximum(
        jnp.dot(x2d, p["wf"], preferred_element_type=jnp.float32) + p["bf"], 0.0)
    c = jnp.dot(feats.astype(jnp.bfloat16), p["wc"],
                preferred_element_type=jnp.float32) + p["bc"]
    return feats, c


if __name__ == "__main__":
    key = jax.random.PRNGKey(0)
    k_x, k_p = jax.random.split(key)

    # Small bag: 32 instances, each a 4x16x16 "image" -> in_dim = 1024.
    N, CH, HH, WW = 32, 4, 16, 16
    FEATURE_SIZE = 256       # multiple of 128 -> lane-dense feats tiles
    OUTPUT_CLASS = 2         # padded to 128 lanes inside the wrapper

    x = jax.random.normal(k_x, (N, CH, HH, WW), jnp.float32)
    params = init_params(k_p, CH * HH * WW, FEATURE_SIZE, OUTPUT_CLASS)

    # tile_k=512 over in_dim=1024 exercises the 2-step K reduction path.
    feats, c = iclassifier_forward(x, params, tile_n=256, tile_k=512)
    jax.block_until_ready((feats, c))

    # Correctness check against the pure-JAX reference (same bf16/f32 numerics).
    ref_feats, ref_c = reference_forward(x, params)
    assert feats.shape == (N, FEATURE_SIZE) and c.shape == (N, OUTPUT_CLASS)
    assert jnp.allclose(feats, ref_feats, atol=5e-3, rtol=5e-3)
    assert jnp.allclose(c, ref_c, atol=5e-3, rtol=5e-3)

    print("KERNEL_OK")
</pallas_src>

<mosaic_0001>
module attributes {stable_mosaic.version = 11 : i64} {
  func.func @iclassifier_kernel(%arg0: i32, %arg1: i32, %arg2: memref<32x512xbf16, #tpu.memory_space<vmem>>, %arg3: memref<512x256xbf16, #tpu.memory_space<vmem>>, %arg4: memref<1x256xf32, #tpu.memory_space<vmem>>, %arg5: memref<256x128xbf16, #tpu.memory_space<vmem>>, %arg6: memref<1x128xf32, #tpu.memory_space<vmem>>, %arg7: memref<32x256xf32, #tpu.memory_space<vmem>>, %arg8: memref<32x128xf32, #tpu.memory_space<vmem>>, %arg9: memref<32x256xf32, #tpu.memory_space<vmem>>) attributes {dimension_semantics = [#tpu.dimension_semantics<parallel>, #tpu.dimension_semantics<arbitrary>], iteration_bounds = array<i64: 1, 2>, scalar_prefetch = 0 : i64, scratch_operands = 1 : i64, tpu.core_type = #tpu.core_type<tc>, window_params = [{transform_indices = @transform_0, window_bounds = array<i64: 32, 512>}, {transform_indices = @transform_1, window_bounds = array<i64: 512, 256>}, {pipeline_mode = #tpu.pipeline_mode<synchronous>, transform_indices = @transform_2, window_bounds = array<i64: 1, 256>}, {pipeline_mode = #tpu.pipeline_mode<synchronous>, transform_indices = @transform_3, window_bounds = array<i64: 256, 128>}, {pipeline_mode = #tpu.pipeline_mode<synchronous>, transform_indices = @transform_4, window_bounds = array<i64: 1, 128>}, {transform_indices = @transform_5, window_bounds = array<i64: 32, 256>}, {transform_indices = @transform_6, window_bounds = array<i64: 32, 128>}]} {
    %c0_i32 = arith.constant 0 : i32
    %0 = arith.cmpi eq, %arg1, %c0_i32 : i32
    %1 = arith.extui %0 : i1 to i32
    %c0_i32_0 = arith.constant 0 : i32
    %2 = arith.cmpi ne, %1, %c0_i32_0 : i32
    scf.if %2 {
      %cst_9 = arith.constant 0.000000e+00 : f32
      %12 = vector.broadcast %cst_9 : f32 to vector<32x256xf32>
      %c0_10 = arith.constant 0 : index
      %c0_11 = arith.constant 0 : index
      %13 = vector.load %arg9[%c0_10, %c0_11] : memref<32x256xf32, #tpu.memory_space<vmem>>, vector<32x256xf32>
      tpu.vector_store %arg9[%c0_10, %c0_11], %12 {strides = array<i32>} : memref<32x256xf32, #tpu.memory_space<vmem>>, vector<32x256xf32>,
    } else {
    }
    %c0 = arith.constant 0 : index
    %c0_1 = arith.constant 0 : index
    %3 = vector.load %arg9[%c0, %c0_1] : memref<32x256xf32, #tpu.memory_space<vmem>>, vector<32x256xf32>
    %c0_2 = arith.constant 0 : index
    %c0_3 = arith.constant 0 : index
    %4 = vector.load %arg2[%c0_2, %c0_3] : memref<32x512xbf16, #tpu.memory_space<vmem>>, vector<32x512xbf16>
    %c0_4 = arith.constant 0 : index
    %c0_5 = arith.constant 0 : index
    %5 = vector.load %arg3[%c0_4, %c0_5] : memref<512x256xbf16, #tpu.memory_space<vmem>>, vector<512x256xbf16>
    %cst = arith.constant dense<0.000000e+00> : vector<32x256xf32>
    %6 = tpu.matmul %4, %5, %cst {dimension_numbers = #tpu.dot_dimension_numbers<[1], [0], [0], [1], [0, 0, 1, 1], [], []>} : vector<32x512xbf16>, vector<512x256xbf16>, vector<32x256xf32> -> vector<32x256xf32>
    %7 = arith.addf %3, %6 : vector<32x256xf32>
    %c0_6 = arith.constant 0 : index
    %c0_7 = arith.constant 0 : index
    %8 = vector.load %arg9[%c0_6, %c0_7] : memref<32x256xf32, #tpu.memory_space<vmem>>, vector<32x256xf32>
    tpu.vector_store %arg9[%c0_6, %c0_7], %7 {strides = array<i32>} : memref<32x256xf32, #tpu.memory_space<vmem>>, vector<32x256xf32>,
    %c1_i32 = arith.constant 1 : i32
    %9 = arith.cmpi eq, %arg1, %c1_i32 : i32
    %10 = arith.extui %9 : i1 to i32
    %c0_i32_8 = arith.constant 0 : i32
    %11 = arith.cmpi ne, %10, %c0_i32_8 : i32
    scf.if %11 {
      %c0_9 = arith.constant 0 : index
      %c0_10 = arith.constant 0 : index
      %12 = vector.load %arg9[%c0_9, %c0_10] : memref<32x256xf32, #tpu.memory_space<vmem>>, vector<32x256xf32>
      %c0_11 = arith.constant 0 : index
      %c0_12 = arith.constant 0 : index
      %13 = vector.load %arg4[%c0_11, %c0_12] : memref<1x256xf32, #tpu.memory_space<vmem>>, vector<1x256xf32>
      %14 = vector.broadcast %13 : vector<1x256xf32> to vector<32x256xf32>
      %15 = arith.addf %12, %14 : vector<32x256xf32>
      %cst_13 = arith.constant 0.000000e+00 : f32
      %16 = vector.broadcast %cst_13 : f32 to vector<32x256xf32>
      %17 = arith.maximumf %15, %16 : vector<32x256xf32>
      %c0_14 = arith.constant 0 : index
      %c0_15 = arith.constant 0 : index
      %18 = vector.load %arg7[%c0_14, %c0_15] : memref<32x256xf32, #tpu.memory_space<vmem>>, vector<32x256xf32>
      tpu.vector_store %arg7[%c0_14, %c0_15], %17 {strides = array<i32>} : memref<32x256xf32, #tpu.memory_space<vmem>>, vector<32x256xf32>,
      %19 = arith.truncf %17 : vector<32x256xf32> to vector<32x256xbf16>
      %c0_16 = arith.constant 0 : index
      %c0_17 = arith.constant 0 : index
      %20 = vector.load %arg5[%c0_16, %c0_17] : memref<256x128xbf16, #tpu.memory_space<vmem>>, vector<256x128xbf16>
      %cst_18 = arith.constant dense<0.000000e+00> : vector<32x128xf32>
      %21 = tpu.matmul %19, %20, %cst_18 {dimension_numbers = #tpu.dot_dimension_numbers<[1], [0], [0], [1], [0, 0, 1, 1], [], []>} : vector<32x256xbf16>, vector<256x128xbf16>, vector<32x128xf32> -> vector<32x128xf32>
      %c0_19 = arith.constant 0 : index
      %c0_20 = arith.constant 0 : index
      %22 = vector.load %arg6[%c0_19, %c0_20] : memref<1x128xf32, #tpu.memory_space<vmem>>, vector<1x128xf32>
      %23 = vector.broadcast %22 : vector<1x128xf32> to vector<32x128xf32>
      %24 = arith.addf %21, %23 : vector<32x128xf32>
      %c0_21 = arith.constant 0 : index
      %c0_22 = arith.constant 0 : index
      %25 = vector.load %arg8[%c0_21, %c0_22] : memref<32x128xf32, #tpu.memory_space<vmem>>, vector<32x128xf32>
      tpu.vector_store %arg8[%c0_21, %c0_22], %24 {strides = array<i32>} : memref<32x128xf32, #tpu.memory_space<vmem>>, vector<32x128xf32>,
    } else {
    }
    return
  }
  func.func @transform_0(%arg0: i32, %arg1: i32) -> (i32, i32) {
    %c0_i32 = arith.constant 0 : i32
    return %arg0, %arg1 : i32, i32
  }
  func.func @transform_1(%arg0: i32, %arg1: i32) -> (i32, i32) {
    %c0_i32 = arith.constant 0 : i32
    %c0_i32_0 = arith.constant 0 : i32
    return %arg1, %c0_i32 : i32, i32
  }
  func.func @transform_2(%arg0: i32, %arg1: i32) -> (i32, i32) {
    %c0_i32 = arith.constant 0 : i32
    %c0_i32_0 = arith.constant 0 : i32
    %c0_i32_1 = arith.constant 0 : i32
    return %c0_i32, %c0_i32_0 : i32, i32
  }
  func.func @transform_3(%arg0: i32, %arg1: i32) -> (i32, i32) {
    %c0_i32 = arith.constant 0 : i32
    %c0_i32_0 = arith.constant 0 : i32
    %c0_i32_1 = arith.constant 0 : i32
    return %c0_i32, %c0_i32_0 : i32, i32
  }
  func.func @transform_4(%arg0: i32, %arg1: i32) -> (i32, i32) {
    %c0_i32 = arith.constant 0 : i32
    %c0_i32_0 = arith.constant 0 : i32
    %c0_i32_1 = arith.constant 0 : i32
    return %c0_i32, %c0_i32_0 : i32, i32
  }
  func.func @transform_5(%arg0: i32, %arg1: i32) -> (i32, i32) {
    %c0_i32 = arith.constant 0 : i32
    %c0_i32_0 = arith.constant 0 : i32
    return %arg0, %c0_i32 : i32, i32
  }
  func.func @transform_6(%arg0: i32, %arg1: i32) -> (i32, i32) {
    %c0_i32 = arith.constant 0 : i32
    %c0_i32_0 = arith.constant 0 : i32
    return %arg0, %c0_i32 : i32, i32
  }
}

</mosaic_0001>

<bundles_post_ra>
// kernel: tpu_custom_call.1
= control target key start
LH: loop header
LB: loop body
LE: loop exit
PB: predicated region body
PF: predicated region fallthrough
CT: control target
= control target key end

     0   :  { %s2274_s0 = inlined_call_operand.hbm [shape: bf16[32,1024], index: 0, kind: input, shape index: {}]   ;;  %s2275_s1 = inlined_call_operand.hbm [shape: bf16[1024,256], index: 1, kind: input, shape index: {}]   ;;  %s2276_s2 = inlined_call_operand.vmem [shape: f32[1,256], index: 2, kind: input, shape index: {}]   ;;  %s2277_s3 = inlined_call_operand.hbm [shape: bf16[256,128], index: 3, kind: input, shape index: {}]   ;;  %s2278_s4 = inlined_call_operand.vmem [shape: f32[1,128], index: 4, kind: input, shape index: {}]   ;;  %s2279_s5 = inlined_call_operand.hbm [shape: f32[32,256], index: 5, kind: output, shape index: {0}]   ;;  %s2280_s6 = inlined_call_operand.hbm [shape: f32[32,128], index: 6, kind: output, shape index: {1}]  }
   0x1   :  { %2286 = sst [smem:[#allocation19_spill]] %s2274_s0 }
   0x2   :  { %2287 = sst [smem:[#allocation20_spill]] %s2277_s3 }
   0x3   :  { %12 = vsyncpa [#allocation4], 0 }
   0x4   :  { %14 = vsyncpa [#allocation4 + $0x1], 0 }
   0x5   :  { %15 = vsyncpa [#allocation7], 0 }
   0x6   :  { %17 = vsyncpa [#allocation7 + $0x1], 0 }
   0x7   :  { %18 = vsyncpa [#allocation5], 0 }
   0x8   :  { %19 = vsyncpa [#allocation11], 0  ;;  %s1945_s21 = smov 0   ;;  %s1947_s22 = smov 0  }
   0x9   :  { %s1949_s23 = smov 0   ;;  %s1951_s24 = smov 0  }
   0xa   :  { %s1953_s25 = smov 0   ;;  %s1955_s26 = smov 0  }
   0xb LB: > { %s1974_s27 = sadd.s32 4294967295, %s1891_s26   ;;  %s46_s28 = sadd.s32 1, %s1879_s23  ;;  %s1891_s26 = sphi %s1955_s26, %s25_s26   ;;  %s1887_s25 = sphi %s1953_s25, %s2308_s25   ;;  %s1883_s24 = sphi %s1951_s24, %s2307_s24   ;;  %s1879_s23 = sphi %s1949_s23, %s2306_s23   ;;  %s1875_s22 = sphi %s1947_s22, %s2305_s22   ;;  %s1871_s21 = sphi %s1945_s21, %s2304_s21  }
   0xc   : > { %p53_p0 = scmp.ne.s32.totalorder %s1879_s23, %s1875_s22  ;;  %p54_p1 = scmp.eq.s32.totalorder %s1891_s26, 0 }
   0xd   : > { %p59_p2 = scmp.ne.s32.totalorder %s1875_s22, %s1871_s21  ;;  %p2281_p3 = scmp.eq.s32.totalorder %s1974_s27, 0 }
   0xe   : > { %p55_p4 = por %p54_p1, %p53_p0  ;;  %p1298_p5 = scmp.ge.s32.totalorder %s1891_s26, 1 }
   0xf   : > { %p1985_p6 = por %p2281_p3, %p59_p2  ;;  %p211_p7 = scmp.lt.s32.totalorder %s1891_s26, 3 }
  0x10   : > { %s1893_s7 = smov [#allocation8]   ;;  %p1492_p10 = scmp.lt.s32.totalorder %s1891_s26, 2 }
  0x11   : > { %s2288_s29 = scalar_select %p1985_p6, 1, 0 }
  0x12   : > { %p1990_p8 = pnand %p1298_p5, %p211_p7  ;;  %s226_s8 = sshll.u32 %s1893_s7, 4  ;;  %s227_s8 = int_to_ptr.vmem [resolvable:$true] %s226_s8 }
  0x13   : > { %p2003_p12 = pnand %p1492_p10, %p55_p4  ;;  %s34_s11 = sadd.s32 1, %s1887_s25 }
  0x14   : > { %s2289_s30 = scalar_select %p1990_p8, 1, 0 }
  0x15   : > { %p1480_p9 = pneg %p1990_p8  ;;  %s2292_s3 = sld [smem:[#allocation20_spill]] }
  0x16   : > { %s2291_s10 = scalar_select %p2003_p12, 1, 0 }
  0x17   : > { %p1999_p11 = pnand %p1480_p9, %p2281_p3 }
  0x19   : > { %p1687_p0 = pneg %p1999_p11 }
  0x1b   : > { %s1685_s14 = scalar_lea.hbm %s2292_s3, 2048 }
  0x1c   : > { %p1686_p13 = scmp.ne.s32.totalorder %s2292_s3, %s1685_s14  ;;  %p1692_p4 = scmp.lt.u32.totalorder %s1685_s14, %s2292_s3 }
  0x1e   : > { %p1688_p1 = pnand %p1687_p0, %p1686_p13 }
  0x20   : > { %p1689_p2 = pneg %p1688_p1 }
  0x22   : > { %p1694_p5 = pnand %p1692_p4, %p1689_p2 }
  0x24   : > { %1697 = shalt.err (!%p1694_p5)
}
  0x25   : > { %s1698_s19 = scalar_lea.vmem %s227_s8, 2048  ;;  %p1706_p3 = scmp.lt.s32.totalorder %s227_s8, %s227_s8 }
  0x26   : > { %p1699_p7 = scmp.ne.s32.totalorder %s227_s8, %s1698_s19  ;;  %p1707_p6 = scmp.lt.s32.totalorder %s1698_s19, %s1698_s19 }
  0x28   : > { %p1701_p9 = pnand %p1699_p7, %p1687_p0  ;;  %p1708_p8 = por %p1707_p6, %p1706_p3 }
  0x2a   : > { %p1702_p10 = pneg %p1701_p9 }
  0x2c   : > { %p1709_p12 = pnand %p1708_p8, %p1702_p10 }
  0x2e   : > { %1712 = shalt.err (!%p1709_p12)
}
  0x2f   : > { %s1894_s20 = smov 64   ;;  %s1895_s21 = smov 4  }
  0x30   : > { %1483 = dma.hbm_to_vmem [thread:$0]  (!%p1999_p11), %s2292_s3, 2048, %s227_s8, [#allocation7], %s1894_s20, %s1894_s20, %s1895_s21  }
  0x31   : > { %p35_p13 = scmp.ge.s32.totalorder %s34_s11, 2  ;;  %s2025_s13 = sand.u32 1, %s1879_s23  }
  0x32   : > { %s1409_s14 = sshll.u32 %s1887_s25, 8  ;;  %s1301_s15 = sshll.u32 %s2025_s13, 6 }
  0x33   : > { %s2310_s11 = smov (%p35_p13, %s34_s11), 0  ;;  %s2294_s0 = sld [smem:[#allocation19_spill]] }
  0x34   : > { %2293 = sst [smem:[#allocation17_spill]] %s2310_s11  ;;  %s42_s16 = ssub.s32 %s1887_s25, %s2310_s11 }
  0x35   : > { %p44_p3 = scmp.eq.s32.totalorder %s42_s16, 0  ;;  %s247_s8 = scalar_lea.vmem [#allocation3], %s1301_s15 }
  0x36   : > { %s257_s19 = sshll.u32 %s247_s8, 4  ;;  %s244_s7 = scalar_lea.sflag [#allocation4], %s2025_s13  ;;  %s2043_s19 = int_to_ptr.vmem [resolvable:$true] %s257_s19 }
  0x37   : > { %s2041_s20 = scalar_select %p44_p3, %s1879_s23, %s46_s28  }
  0x38   : > { %p2296_p8 = scmp.ne.s32.totalorder %s2291_s10, 0 }
  0x39   : > { %s2036_s18 = scalar_lea.hbm %s2294_s0, %s1409_s14  ;;  %2295 = sst [smem:[#allocation18_spill]] %s2041_s20 }
  0x3a   : > { %s1713_s12 = scalar_lea.hbm %s2036_s18, 1024  ;;  %p1715_p11 = pneg %p2296_p8 }
  0x3b   : > { %p1714_p6 = scmp.ne.s32.totalorder %s2036_s18, %s1713_s12  ;;  %s1718_s15 = scalar_lea.hbm %s2294_s0, 2048 }
  0x3c   : > { %p1719_p1 = scmp.lt.u32.totalorder %s2036_s18, %s2294_s0  ;;  %p1720_p2 = scmp.lt.u32.totalorder %s1718_s15, %s1713_s12 }
  0x3d   : > { %p1716_p12 = pnand %p1715_p11, %p1714_p6  ;;  %p1722_p5 = scmp.lt.u32.totalorder %s1713_s12, %s2036_s18 }
  0x3e   : > { %p1721_p4 = por %p1720_p2, %p1719_p1 }
  0x3f   : > { %p1717_p0 = pneg %p1716_p12 }
  0x40   : > { %p1723_p7 = por %p1722_p5, %p1721_p4 }
  0x42   : > { %p1724_p9 = pnand %p1723_p7, %p1717_p0 }
  0x44   : > { %1727 = shalt.err (!%p1724_p9)
}
  0x45   : > { %s1728_s28 = scalar_lea.vmem %s2043_s19, 1024  ;;  %s1896_s8 = smov [#allocation3]  }
  0x46   : > { %p1729_p10 = scmp.ne.s32.totalorder %s2043_s19, %s1728_s28  ;;  %s1733_s14 = sshll.u32 %s1896_s8, 4  ;;  %s1734_s14 = int_to_ptr.vmem [resolvable:$false] %s1733_s14 }
  0x47   : > { %s1735_s16 = scalar_lea.vmem %s1734_s14, 2048  ;;  %p1736_p6 = scmp.lt.s32.totalorder %s2043_s19, %s1734_s14 }
  0x48   : > { %p1731_p13 = pnand %p1729_p10, %p1715_p11  ;;  %p1737_p12 = scmp.lt.s32.totalorder %s1735_s16, %s1728_s28 }
  0x4a   : > { %p1732_p3 = pneg %p1731_p13  ;;  %p1738_p1 = por %p1737_p12, %p1736_p6 }
  0x4c   : > { %p1739_p2 = pnand %p1738_p1, %p1732_p3 }
  0x4e   : > { %1742 = shalt.err (!%p1739_p2)
}
  0x4f   : > { %s1897_s12 = smov 512   ;;  %s1898_s15 = smov 256  }
  0x50   : > { %s1899_s17 = smov 16   ;;  %s1304_s9 = sshll.u32 %s2025_s13, 9 }
  0x51   : > { %1487 = dma.hbm_to_vmem [thread:$0]  (!%p2296_p8), %s2036_s18, 1024, %s2043_s19, %s244_s7, %s1897_s12, %s1898_s15, %s1899_s17  }
  0x52   : > { %s1411_s8 = sshll.u32 %s1887_s25, 13  ;;  %s271_s21 = scalar_lea.vmem [#allocation6], %s1304_s9 }
  0x53   : > { %s2079_s16 = scalar_lea.hbm %s2275_s1, %s1411_s8  ;;  %s279_s0 = sshll.u32 %s271_s21, 4  ;;  %s2081_s0 = int_to_ptr.vmem [resolvable:$true] %s279_s0 }
  0x54   : > { %s2297_s3 = sand.u32 1, %s1891_s26   ;;  %s1743_s20 = scalar_lea.hbm %s2079_s16, 8192 }
  0x55   : > { %s2085_s11 = scalar_lea.sflag [#allocation7], %s2297_s3  ;;  %p1744_p0 = scmp.ne.s32.totalorder %s2079_s16, %s1743_s20 }
  0x56   : > { %s1748_s19 = scalar_lea.hbm %s2275_s1, 16384  ;;  %p1749_p7 = scmp.lt.u32.totalorder %s2079_s16, %s2275_s1 }
  0x57   : > { %p1746_p4 = pnand %p1744_p0, %p1715_p11  ;;  %p1750_p9 = scmp.lt.u32.totalorder %s1748_s19, %s1743_s20 }
  0x58   : > { %p1752_p13 = scmp.lt.u32.totalorder %s1743_s20, %s2079_s16 }
  0x59   : > { %p1747_p5 = pneg %p1746_p4  ;;  %p1751_p10 = por %p1750_p9, %p1749_p7 }
  0x5b   : > { %p1753_p3 = por %p1752_p13, %p1751_p10 }
  0x5d   : > { %p1754_p6 = pnand %p1753_p3, %p1747_p5 }
  0x5f   : > { %1757 = shalt.err (!%p1754_p6)
}
  0x60   : > { %s1758_s3 = scalar_lea.vmem %s2081_s0, 8192  ;;  %s1900_s21 = smov [#allocation6]  }
  0x61   : > { %p1759_p12 = scmp.ne.s32.totalorder %s2081_s0, %s1758_s3  ;;  %s1763_s15 = sshll.u32 %s1900_s21, 4  ;;  %s1764_s15 = int_to_ptr.vmem [resolvable:$false] %s1763_s15 }
  0x62   : > { %s1765_s17 = scalar_lea.vmem %s1764_s15, 16384  ;;  %p1766_p0 = scmp.lt.s32.totalorder %s2081_s0, %s1764_s15 }
  0x63   : > { %p1761_p1 = pnand %p1759_p12, %p1715_p11  ;;  %p1767_p4 = scmp.lt.s32.totalorder %s1765_s17, %s1758_s3 }
  0x65   : > { %p1762_p2 = pneg %p1761_p1  ;;  %p1768_p7 = por %p1767_p4, %p1766_p0 }
  0x67   : > { %p1769_p9 = pnand %p1768_p7, %p1762_p2 }
  0x69   : > { %1772 = shalt.err (!%p1769_p9)
}
  0x6a   : > { %s1901_s20 = smov 128   ;;  %s1902_s9 = smov 8  }
  0x6b   : > { %1490 = dma.hbm_to_vmem [thread:$0]  (!%p2296_p8), %s2079_s16, 8192, %s2081_s0, %s2085_s11, %s1901_s20, %s1901_s20, %s1902_s9  }
  0x6c   : > { %p2298_p11 = scmp.ne.s32.totalorder %s2289_s30, 0 }
  0x6d   : > { %s293_s8 = sand.u32 (!%p2298_p11), 1, %s1875_s22   ;;  %p2299_p5 = scmp.ne.s32.totalorder (!%p2298_p11), %s2288_s29, 0 }
  0x6e   : > { %291 = sbr.rel (%p2298_p11) target bundleno = 713 (0x2c9), region = 40  ;;  %s1309_s28 = sshll.u32 (!%p2298_p11), %s293_s8, 6 }
  0x6f   : > { %s294_s14 = scalar_lea.sflag (!%p2298_p11), [#allocation4], %s293_s8  ;;  %s2114_s13 = scalar_lea.vmem (!%p2298_p11), [#allocation3], %s1309_s28 }
  0x75   : > { %1850 = dma.done.wait (%p2299_p5), %s294_s14, 1024  }
  0x76   : > { %1852 = vsyncadd (%p2299_p5), %s294_s14, 4294966272  ;;  %s302_s18 = sand.u32 1, %s1974_s27   ;;  %s1310_s10 = sshll.u32 %s293_s8, 9 }
  0x77   : > { %s303_s0 = scalar_lea.sflag [#allocation7], %s302_s18  ;;  %s2121_s11 = scalar_lea.vmem [#allocation6], %s1310_s10 }
  0x78   : > { %1854 = dma.done.wait (%p2299_p5), %s303_s0, 8192  }
  0x79   : > { %1856 = vsyncadd (%p2299_p5), %s303_s0, 4294959104  ;;  %p2300_p8 = scmp.eq.s32.totalorder %s1974_s27, 0 }
  0x7b   : > { %1858 = dma.done.wait (%p2300_p8), [#allocation7], 2048   ;;  %p2301_p10 = pmov %p2300_p8 }
  0x7c   : > { %p1312_p13 = scmp.ne.s32.totalorder %s1883_s24, 0 }
  0x7d   : > { %1860 = vsyncadd (%p2301_p10), [#allocation7], 4294965248  ;;  %v1903_v0 = vmov (!%p1312_p13), 0.0  }
  0x7e   : > { %348 = sbr.rel (%p1312_p13) target bundleno = 133 (0x85), region = 56  ;;  %349 = vst [vmem:[#allocation2] sm:$0xff] (!%p1312_p13), %v1903_v0  ;;  %350 = vst [vmem:[#allocation2 + $0x8] sm:$0xff] (!%p1312_p13), %v1903_v0 }
  0x7f   : > { %351 = vst [vmem:[#allocation2 + $0x10] sm:$0xff] (!%p1312_p13), %v1903_v0  ;;  %352 = vst [vmem:[#allocation2 + $0x18] sm:$0xff] (!%p1312_p13), %v1903_v0 }
  0x80   : > { %353 = vst [vmem:[#allocation2 + $0x20] sm:$0xff] (!%p1312_p13), %v1903_v0  ;;  %354 = vst [vmem:[#allocation2 + $0x28] sm:$0xff] (!%p1312_p13), %v1903_v0 }
  0x81   : > { %355 = vst [vmem:[#allocation2 + $0x30] sm:$0xff] (!%p1312_p13), %v1903_v0  ;;  %356 = vst [vmem:[#allocation2 + $0x38] sm:$0xff] (!%p1312_p13), %v1903_v0 }
  0x85 PF: > { %v1561_v1 = vld [vmem:[%s2121_s11 + $0x4] ss:$8 sps:$4 sm:$0xff]   ;;  %v1565_v3 = vld [vmem:[%s2121_s11] ss:$8 sps:$4 sm:$0xff]   ;;  %v1567_v5 = vld [vmem:[%s2121_s11 + $0x14] ss:$8 sps:$4 sm:$0xff]  }
  0x86   : > { %v1563_v2 = vld [vmem:[%s2121_s11 + $0x104] ss:$8 sps:$4 sm:$0xff]   ;;  %797 = vmatprep.subr.bf16.mxu1 %v1561_v1  ;;  %v1566_v4 = vld [vmem:[%s2121_s11 + $0x100] ss:$8 sps:$4 sm:$0xff]   ;;  %v1569_v6 = vld [vmem:[%s2121_s11 + $0x114] ss:$8 sps:$4 sm:$0xff]  }
  0x87   : > { %850 = vmatprep.subr.bf16.mxu0 %v1563_v2  ;;  %798 = vmatpush1.bf16.msra.mxu1 %v1565_v3  ;;  %v1571_v7 = vld [vmem:[%s2121_s11 + $0x10] ss:$8 sps:$4 sm:$0xff]   ;;  %v1573_v9 = vld [vmem:[%s2121_s11 + $0x24] ss:$8 sps:$4 sm:$0xff]   ;;  %v1577_v11 = vld [vmem:[%s2121_s11 + $0x20] ss:$8 sps:$4 sm:$0xff]  }
  0x88   : > { %851 = vmatpush1.bf16.msra.mxu0 %v1566_v4  ;;  %799 = vmatprep.subr.bf16.mxu1 %v1567_v5  ;;  %v1572_v8 = vld [vmem:[%s2121_s11 + $0x110] ss:$8 sps:$4 sm:$0xff]   ;;  %v1575_v10 = vld [vmem:[%s2121_s11 + $0x124] ss:$8 sps:$4 sm:$0xff]   ;;  %v1578_v12 = vld [vmem:[%s2121_s11 + $0x120] ss:$8 sps:$4 sm:$0xff]  }
  0x89   : > { %852 = vmatprep.subr.bf16.mxu0 %v1569_v6  ;;  %v1579_v13 = vld [vmem:[%s2121_s11 + $0x34] ss:$8 sps:$4 sm:$0xff]   ;;  %v1583_v15 = vld [vmem:[%s2121_s11 + $0x30] ss:$8 sps:$4 sm:$0xff]   ;;  %v1585_v17 = vld [vmem:[%s2121_s11 + $0x44] ss:$8 sps:$4 sm:$0xff]  }
  0x8a   : > { %v1581_v14 = vld [vmem:[%s2121_s11 + $0x134] ss:$8 sps:$4 sm:$0xff]   ;;  %v1584_v16 = vld [vmem:[%s2121_s11 + $0x130] ss:$8 sps:$4 sm:$0xff]   ;;  %v1587_v18 = vld [vmem:[%s2121_s11 + $0x144] ss:$8 sps:$4 sm:$0xff]  }
  0x8b   : > { %800 = vmatpush1.bf16.msra.mxu1 %v1571_v7  ;;  %v1589_v19 = vld [vmem:[%s2121_s11 + $0x40] ss:$8 sps:$4 sm:$0xff]   ;;  %v1591_v21 = vld [vmem:[%s2121_s11 + $0x54] ss:$8 sps:$4 sm:$0xff]   ;;  %v1595_v23 = vld [vmem:[%s2121_s11 + $0x50] ss:$8 sps:$4 sm:$0xff]  }
  0x8c   : > { %853 = vmatpush1.bf16.msra.mxu0 %v1572_v8  ;;  %801 = vmatprep.subr.bf16.mxu1 %v1573_v9  ;;  %v1590_v20 = vld [vmem:[%s2121_s11 + $0x140] ss:$8 sps:$4 sm:$0xff]   ;;  %v1593_v22 = vld [vmem:[%s2121_s11 + $0x154] ss:$8 sps:$4 sm:$0xff]   ;;  %v1596_v24 = vld [vmem:[%s2121_s11 + $0x150] ss:$8 sps:$4 sm:$0xff]  }
  0x8d   : > { %854 = vmatprep.subr.bf16.mxu0 %v1575_v10  ;;  %v1597_v25 = vld [vmem:[%s2121_s11 + $0x64] ss:$8 sps:$4 sm:$0xff]   ;;  %v1601_v27 = vld [vmem:[%s2121_s11 + $0x60] ss:$8 sps:$4 sm:$0xff]   ;;  %v1603_v29 = vld [vmem:[%s2121_s11 + $0x74] ss:$8 sps:$4 sm:$0xff]  }
  0x8e   : > { %v1599_v26 = vld [vmem:[%s2121_s11 + $0x164] ss:$8 sps:$4 sm:$0xff]   ;;  %v1602_v28 = vld [vmem:[%s2121_s11 + $0x160] ss:$8 sps:$4 sm:$0xff]   ;;  %v1605_v30 = vld [vmem:[%s2121_s11 + $0x174] ss:$8 sps:$4 sm:$0xff]  }
  0x8f   : > { %802 = vmatpush1.bf16.msra.mxu1 %v1577_v11  ;;  %v1607_v31 = vld [vmem:[%s2121_s11 + $0x70] ss:$8 sps:$4 sm:$0xff]   ;;  %v1609_v33 = vld [vmem:[%s2121_s11 + $0x84] ss:$8 sps:$4 sm:$0xff]   ;;  %v1613_v35 = vld [vmem:[%s2121_s11 + $0x80] ss:$8 sps:$4 sm:$0xff]  }
  0x90   : > { %855 = vmatpush1.bf16.msra.mxu0 %v1578_v12  ;;  %803 = vmatprep.subr.bf16.mxu1 %v1579_v13  ;;  %v1608_v32 = vld [vmem:[%s2121_s11 + $0x170] ss:$8 sps:$4 sm:$0xff]   ;;  %v1611_v34 = vld [vmem:[%s2121_s11 + $0x184] ss:$8 sps:$4 sm:$0xff]   ;;  %v1614_v36 = vld [vmem:[%s2121_s11 + $0x180] ss:$8 sps:$4 sm:$0xff]  }
  0x91   : > { %856 = vmatprep.subr.bf16.mxu0 %v1581_v14  ;;  %v1615_v37 = vld [vmem:[%s2121_s11 + $0x94] ss:$8 sps:$4 sm:$0xff]   ;;  %v1619_v39 = vld [vmem:[%s2121_s11 + $0x90] ss:$8 sps:$4 sm:$0xff]   ;;  %v1621_v41 = vld [vmem:[%s2121_s11 + $0xa4] ss:$8 sps:$4 sm:$0xff]  }
  0x92   : > { %v1617_v38 = vld [vmem:[%s2121_s11 + $0x194] ss:$8 sps:$4 sm:$0xff]   ;;  %v1620_v40 = vld [vmem:[%s2121_s11 + $0x190] ss:$8 sps:$4 sm:$0xff]   ;;  %v1623_v42 = vld [vmem:[%s2121_s11 + $0x1a4] ss:$8 sps:$4 sm:$0xff]  }
  0x93   : > { %804 = vmatpush1.bf16.msra.mxu1 %v1583_v15  ;;  %v1625_v43 = vld [vmem:[%s2121_s11 + $0xa0] ss:$8 sps:$4 sm:$0xff]   ;;  %v1627_v45 = vld [vmem:[%s2121_s11 + $0xb4] ss:$8 sps:$4 sm:$0xff]   ;;  %v1631_v47 = vld [vmem:[%s2121_s11 + $0xb0] ss:$8 sps:$4 sm:$0xff]  }
  0x94   : > { %857 = vmatpush1.bf16.msra.mxu0 %v1584_v16  ;;  %805 = vmatprep.subr.bf16.mxu1 %v1585_v17  ;;  %v1626_v44 = vld [vmem:[%s2121_s11 + $0x1a0] ss:$8 sps:$4 sm:$0xff]   ;;  %v1629_v46 = vld [vmem:[%s2121_s11 + $0x1b4] ss:$8 sps:$4 sm:$0xff]   ;;  %v1632_v48 = vld [vmem:[%s2121_s11 + $0x1b0] ss:$8 sps:$4 sm:$0xff]  }
  0x95   : > { %858 = vmatprep.subr.bf16.mxu0 %v1587_v18  ;;  %v1633_v49 = vld [vmem:[%s2121_s11 + $0xc4] ss:$8 sps:$4 sm:$0xff]   ;;  %v1637_v53 = vld [vmem:[%s2121_s11 + $0xc0] ss:$8 sps:$4 sm:$0xff]   ;;  %v1639_v55 = vld [vmem:[%s2121_s11 + $0xd4] ss:$8 sps:$4 sm:$0xff]  }
  0x96   : > { %v1659_v50 = vld [vmem:[%s2114_s13 + $0x4] ss:$16 sps:$4 sm:$0xff]   ;;  %v1662_v52 = vld [vmem:[%s2114_s13 + $0xc] ss:$16 sps:$4 sm:$0xff]   ;;  %v1638_v54 = vld [vmem:[%s2121_s11 + $0x1c0] ss:$8 sps:$4 sm:$0xff]  }
  0x97   : > { %806 = vmatpush1.bf16.msra.mxu1 %v1589_v19  ;;  %v1635_v51 = vld [vmem:[%s2121_s11 + $0x1c4] ss:$8 sps:$4 sm:$0xff]   ;;  %829 = vmatprep.mubr.bf16.mxu1 %v1659_v50  ;;  %v1641_v56 = vld [vmem:[%s2121_s11 + $0x1d4] ss:$8 sps:$4 sm:$0xff]   ;;  %v1643_v57 = vld [vmem:[%s2121_s11 + $0xd0] ss:$8 sps:$4 sm:$0xff]  }
  0x98   : > { %859 = vmatpush1.bf16.msra.mxu0 %v1590_v20  ;;  %807 = vmatprep.subr.bf16.mxu1 %v1591_v21  ;;  %v1644_v58 = vld [vmem:[%s2121_s11 + $0x1d0] ss:$8 sps:$4 sm:$0xff]   ;;  %v1645_v59 = vld [vmem:[%s2121_s11 + $0xe4] ss:$8 sps:$4 sm:$0xff]   ;;  %v1649_v61 = vld [vmem:[%s2121_s11 + $0xe0] ss:$8 sps:$4 sm:$0xff]  }
  0x99   : > { %860 = vmatprep.subr.bf16.mxu0 %v1593_v22  ;;  %882 = vmatprep.mubr.bf16.mxu0 %v1662_v52  ;;  %v1647_v60 = vld [vmem:[%s2121_s11 + $0x1e4] ss:$8 sps:$4 sm:$0xff]   ;;  %v1650_v62 = vld [vmem:[%s2121_s11 + $0x1e0] ss:$8 sps:$4 sm:$0xff]   ;;  %v1651_v63 = vld [vmem:[%s2121_s11 + $0xf4] ss:$8 sps:$4 sm:$0xff]  }
  0x9a   : > { %v1653_v0 = vld [vmem:[%s2121_s11 + $0x1f4] ss:$8 sps:$4 sm:$0xff]   ;;  %v1655_v1 = vld [vmem:[%s2121_s11 + $0xf0] ss:$8 sps:$4 sm:$0xff]   ;;  %v357_v10 = vld [vmem:[#allocation2] sm:$0xff]  ;;  %p1385_p3 = scmp.ne.s32.totalorder %s1883_s24, 1 }
  0x9b   : > { %808 = vmatpush1.bf16.msra.mxu1 %v1595_v23  ;;  %v1656_v2 = vld [vmem:[%s2121_s11 + $0x1f0] ss:$8 sps:$4 sm:$0xff]   ;;  %v1663_v5 = vld [vmem:[%s2114_s13 + $0x24] ss:$16 sps:$4 sm:$0xff]   ;;  %v1665_v6 = vld [vmem:[%s2114_s13 + $0x2c] ss:$16 sps:$4 sm:$0xff]  }
  0x9c   : > { %861 = vmatpush1.bf16.msra.mxu0 %v1596_v24  ;;  %809 = vmatprep.subr.bf16.mxu1 %v1597_v25  ;;  %v1657_v3 = vld [vmem:[%s2114_s13] ss:$16 sps:$4 sm:$0xff]   ;;  %v1660_v4 = vld [vmem:[%s2114_s13 + $0x8] ss:$16 sps:$4 sm:$0xff]  }
  0x9d   : > { %862 = vmatprep.subr.bf16.mxu0 %v1599_v26  ;;  %v1667_v7 = vld [vmem:[%s2114_s13 + $0x20] ss:$16 sps:$4 sm:$0xff]   ;;  %v1668_v8 = vld [vmem:[%s2114_s13 + $0x28] ss:$16 sps:$4 sm:$0xff]  }
  0x9e   : > { %v358_v14 = vld [vmem:[#allocation2 + $0x8] sm:$0xff]  ;;  %v359_v18 = vld [vmem:[#allocation2 + $0x10] sm:$0xff]  ;;  %v360_v23 = vld [vmem:[#allocation2 + $0x18] sm:$0xff] }
  0x9f   : > { %810 = vmatpush1.bf16.msra.mxu1 %v1601_v27  ;;  %v1670_v50 = vld [vmem:[#allocation8] sm:$0xff] (!%p1385_p3)   ;;  %v1672_v52 = vld [vmem:[#allocation8 + $0x8] sm:$0xff] (!%p1385_p3)  }
  0xa0   : > { %863 = vmatpush1.bf16.msra.mxu0 %v1602_v28  ;;  %811 = vmatprep.subr.bf16.mxu1 %v1603_v29 }
  0xa1   : > { %864 = vmatprep.subr.bf16.mxu0 %v1605_v30  ;;  %v361_v30 = vld [vmem:[#allocation2 + $0x20] sm:$0xff] }
  0xa3   : > { %812 = vmatpush1.bf16.msra.mxu1 %v1607_v31 }
  0xa4   : > { %865 = vmatpush1.bf16.msra.mxu0 %v1608_v32  ;;  %813 = vmatprep.subr.bf16.mxu1 %v1609_v33 }
  0xa5   : > { %866 = vmatprep.subr.bf16.mxu0 %v1611_v34  ;;  %v362_v34 = vld [vmem:[#allocation2 + $0x28] sm:$0xff] }
  0xa7   : > { %814 = vmatpush1.bf16.msra.mxu1 %v1613_v35 }
  0xa8   : > { %867 = vmatpush1.bf16.msra.mxu0 %v1614_v36  ;;  %815 = vmatprep.subr.bf16.mxu1 %v1615_v37 }
  0xa9   : > { %868 = vmatprep.subr.bf16.mxu0 %v1617_v38  ;;  %v363_v38 = vld [vmem:[#allocation2 + $0x30] sm:$0xff] }
  0xab   : > { %816 = vmatpush1.bf16.msra.mxu1 %v1619_v39 }
  0xac   : > { %869 = vmatpush1.bf16.msra.mxu0 %v1620_v40  ;;  %817 = vmatprep.subr.bf16.mxu1 %v1621_v41 }
  0xad   : > { %870 = vmatprep.subr.bf16.mxu0 %v1623_v42 }
  0xaf   : > { %818 = vmatpush1.bf16.msra.mxu1 %v1625_v43  ;;  %v364_v43 = vld [vmem:[#allocation2 + $0x38] sm:$0xff] }
  0xb0   : > { %871 = vmatpush1.bf16.msra.mxu0 %v1626_v44  ;;  %819 = vmatprep.subr.bf16.mxu1 %v1627_v45 }
  0xb1   : > { %872 = vmatprep.subr.bf16.mxu0 %v1629_v46 }
  0xb3   : > { %820 = vmatpush1.bf16.msra.mxu1 %v1631_v47 }
  0xb4   : > { %873 = vmatpush1.bf16.msra.mxu0 %v1632_v48  ;;  %821 = vmatprep.subr.bf16.mxu1 %v1633_v49  ;;  %v1669_v49 = vld [vmem:[#allocation8 + $0x40] sm:$0xff] (!%p1385_p3)  }
  0xb5   : > { %874 = vmatprep.subr.bf16.mxu0 %v1635_v51  ;;  %v1671_v51 = vld [vmem:[#allocation8 + $0x48] sm:$0xff] (!%p1385_p3)  }
  0xb7   : > { %822 = vmatpush1.bf16.msra.mxu1 %v1637_v53  ;;  %v1673_v53 = vld [vmem:[#allocation8 + $0x50] sm:$0xff] (!%p1385_p3)  }
  0xb8   : > { %875 = vmatpush1.bf16.msra.mxu0 %v1638_v54  ;;  %823 = vmatprep.subr.bf16.mxu1 %v1639_v55  ;;  %v933_v54 = vlaneseq (!%p1385_p3)  ;;  %v1674_v55 = vld [vmem:[#allocation8 + $0x10] sm:$0xff] (!%p1385_p3)  }
  0xb9   : > { %876 = vmatprep.subr.bf16.mxu0 %v1641_v56  ;;  %v1675_v56 = vld [vmem:[#allocation8 + $0x58] sm:$0xff] (!%p1385_p3)  }
  0xbb   : > { %824 = vmatpush1.bf16.msra.mxu1 %v1643_v57  ;;  %v934_v57 = vshrl.u32 (!%p1385_p3), %v933_v54, 7 }
  0xbc   : > { %877 = vmatpush1.bf16.msra.mxu0 %v1644_v58  ;;  %825 = vmatprep.subr.bf16.mxu1 %v1645_v59  ;;  %v1676_v58 = vld [vmem:[#allocation8 + $0x18] sm:$0xff] (!%p1385_p3)   ;;  %v1677_v59 = vld [vmem:[#allocation8 + $0x60] sm:$0xff] (!%p1385_p3)  }
  0xbd   : > { %878 = vmatprep.subr.bf16.mxu0 %v1647_v60  ;;  %v935_v60 = vsub.s32 (!%p1385_p3), 0, %v934_v57 }
  0xbf   : > { %826 = vmatpush1.bf16.msra.mxu1 %v1649_v61  ;;  %v939_v61 = vsub.s32 (!%p1385_p3), 1, %v934_v57 }
  0xc0   : > { %879 = vmatpush1.bf16.msra.mxu0 %v1650_v62  ;;  %827 = vmatprep.subr.bf16.mxu1 %v1651_v63  ;;  %v1678_v62 = vld [vmem:[#allocation8 + $0x20] sm:$0xff] (!%p1385_p3)   ;;  %v1679_v63 = vld [vmem:[#allocation8 + $0x68] sm:$0xff] (!%p1385_p3)  }
  0xc1   : > { %880 = vmatprep.subr.bf16.mxu0 %v1653_v0 }
  0xc3   : > { %828 = vmatpush1.bf16.msra.mxu1 %v1655_v1 }
  0xc4   : > { %881 = vmatpush1.bf16.msra.mxu0 %v1656_v2  ;;  %1448 = vmatprep.subr.bf16.mxu1 (!%p1385_p3), %v1669_v49  ;;  %v931_v2 = vld [vmem:[%s2276_s2] sm:$0x3] (!%p1385_p3) }
  0xc5   : > { %1412 = vmatprep.subr.bf16.mxu0 (!%p1385_p3), %v1669_v49 }
  0xc6   : > { %830 = vmatmul.mubr.bf16.vlgmr.msra.gmra.mrb[0].mxu1 %v1657_v3  ;;  %v936_v3 = vrot.slane (!%p1385_p3), %v931_v2, %v935_v60 }
  0xc7   : > { %883 = vmatmul.mubr.bf16.vlgmr.msra.gmra.mrb[0].mxu0 %v1660_v4  ;;  %839 = vmatprep.mubr.bf16.mxu1 %v1663_v5  ;;  %v940_v4 = vrot.slane (!%p1385_p3), %v931_v2, %v939_v61 }
  0xc8   : > { %892 = vmatprep.mubr.bf16.mxu0 %v1665_v6  ;;  %1413 = vmatpush3.bf16.msra.mxu0 (!%p1385_p3), %v1670_v50 }
  0xc9   : > { %1456 = vmatpush3.bf16.msra.mxu1 (!%p1385_p3), %v1670_v50  ;;  %1414 = vmatprep.subr.bf16.mxu0 (!%p1385_p3), %v1671_v51 }
  0xca   : > { %1449 = vmatprep.subr.bf16.mxu1 (!%p1385_p3), %v1671_v51 }
  0xcc   : > { %1415 = vmatpush3.bf16.msra.mxu0 (!%p1385_p3), %v1672_v52 }
  0xcd   : > { %1457 = vmatpush3.bf16.msra.mxu1 (!%p1385_p3), %v1672_v52  ;;  %1416 = vmatprep.subr.bf16.mxu0 (!%p1385_p3), %v1673_v53 }
  0xce   : > { %840 = vmatmul.mubr.bf16.gmra.mrb[4].mxu1 %v1667_v7  ;;  %1450 = vmatprep.subr.bf16.mxu1 (!%p1385_p3), %v1673_v53 }
  0xcf   : > { %893 = vmatmul.mubr.bf16.gmra.mrb[4].mxu0 %v1668_v8 }
  0xd0   : > { %1417 = vmatpush3.bf16.msra.mxu0 (!%p1385_p3), %v1674_v55 }
  0xd1   : > { %1458 = vmatpush3.bf16.msra.mxu1 (!%p1385_p3), %v1674_v55  ;;  %1418 = vmatprep.subr.bf16.mxu0 (!%p1385_p3), %v1675_v56 }
  0xd2   : > { %1451 = vmatprep.subr.bf16.mxu1 (!%p1385_p3), %v1675_v56 }
  0xd4   : > { %1419 = vmatpush3.bf16.msra.mxu0 (!%p1385_p3), %v1676_v58 }
  0xd5   : > { %1459 = vmatpush3.bf16.msra.mxu1 (!%p1385_p3), %v1676_v58  ;;  %1420 = vmatprep.subr.bf16.mxu0 (!%p1385_p3), %v1677_v59 }
  0xd6   : > { %1452 = vmatprep.subr.bf16.mxu1 (!%p1385_p3), %v1677_v59 }
  0xd8   : > { %1421 = vmatpush3.bf16.msra.mxu0 (!%p1385_p3), %v1678_v62 }
  0xd9   : > { %1460 = vmatpush3.bf16.msra.mxu1 (!%p1385_p3), %v1678_v62  ;;  %1422 = vmatprep.subr.bf16.mxu0 (!%p1385_p3), %v1679_v63 }
  0xda   : > { %1453 = vmatprep.subr.bf16.mxu1 (!%p1385_p3), %v1679_v63 }
 0x199   : > { %v831_v9 = vpop.f32.mrb[0].mxu1 }
 0x19a   : > { %v884_v11 = vpop.f32.mrb[0].mxu0  ;;  %v833_v13 = vpop.f32.mrb[1].mxu1 }
 0x19b   : > { %v885_v12 = vadd.f32 %v884_v11, %v831_v9  ;;  %v886_v15 = vpop.f32.mrb[1].mxu0  ;;  %v835_v17 = vpop.f32.mrb[2].mxu1 }
 0x19c   : > { %v887_v16 = vadd.f32 %v886_v15, %v833_v13  ;;  %v888_v19 = vpop.f32.mrb[2].mxu0  ;;  %v837_v22 = vpop.f32.mrb[3].mxu1  ;;  %v1681_v15 = vld [vmem:[#allocation8 + $0x70] sm:$0xff] (!%p1385_p3)  }
 0x19d   : > { %v903_v20 = vadd.f32 %v885_v12, %v357_v10  ;;  %v889_v21 = vadd.f32 %v888_v19, %v835_v17  ;;  %v890_v24 = vpop.f32.mrb[3].mxu0  ;;  %v1680_v10 = vld [vmem:[#allocation8 + $0x28] sm:$0xff] (!%p1385_p3)  }
 0x19e   : > { %v904_v25 = vadd.f32 %v887_v16, %v358_v14  ;;  %v891_v26 = vadd.f32 %v890_v24, %v837_v22  ;;  %1423 = vmatpush3.bf16.msra.mxu0 (!%p1385_p3), %v1680_v10  ;;  %1461 = vmatpush3.bf16.msra.mxu1 (!%p1385_p3), %v1680_v10 }
 0x19f   : > { %911 = vst [vmem:[#allocation2] sm:$0xff] %v903_v20  ;;  %v905_v27 = vadd.f32 %v889_v21, %v359_v18  ;;  %1424 = vmatprep.subr.bf16.mxu0 (!%p1385_p3), %v1681_v15  ;;  %1454 = vmatprep.subr.bf16.mxu1 (!%p1385_p3), %v1681_v15 }
 0x1a0   : > { %912 = vst [vmem:[#allocation2 + $0x8] sm:$0xff] %v904_v25  ;;  %v906_v28 = vadd.f32 %v891_v26, %v360_v23 }
 0x1a1   : > { %913 = vst [vmem:[#allocation2 + $0x10] sm:$0xff] %v905_v27  ;;  %v841_v29 = vpop.f32.mrb[4].mxu1  ;;  %v1682_v27 = vld [vmem:[#allocation8 + $0x30] sm:$0xff] (!%p1385_p3)  }
 0x1a2   : > { %914 = vst [vmem:[#allocation2 + $0x18] sm:$0xff] %v906_v28  ;;  %v894_v31 = vpop.f32.mrb[4].mxu0  ;;  %v843_v33 = vpop.f32.mrb[5].mxu1  ;;  %1425 = vmatpush3.bf16.msra.mxu0 (!%p1385_p3), %v1682_v27  ;;  %1462 = vmatpush3.bf16.msra.mxu1 (!%p1385_p3), %v1682_v27 }
 0x1a3   : > { %v895_v32 = vadd.f32 %v894_v31, %v841_v29  ;;  %v896_v35 = vpop.f32.mrb[5].mxu0  ;;  %v845_v37 = vpop.f32.mrb[6].mxu1 }
 0x1a4   : > { %v897_v36 = vadd.f32 %v896_v35, %v843_v33  ;;  %v898_v39 = vpop.f32.mrb[6].mxu0  ;;  %v847_v42 = vpop.f32.mrb[7].mxu1  ;;  %922 = sbr.rel (%p1385_p3) target bundleno = 661 (0x295), region = 60  ;;  %v1684_v33 = vld [vmem:[#allocation8 + $0x38] sm:$0xff] (!%p1385_p3)  }
 0x1a5   : > { %v907_v40 = vadd.f32 %v895_v32, %v361_v30  ;;  %v899_v41 = vadd.f32 %v898_v39, %v845_v37  ;;  %v900_v44 = vpop.f32.mrb[7].mxu0  ;;  %v1683_v30 = vld [vmem:[#allocation8 + $0x78] sm:$0xff] (!%p1385_p3)  }
 0x1a6   : > { %v908_v45 = vadd.f32 %v897_v36, %v362_v34  ;;  %v901_v46 = vadd.f32 %v900_v44, %v847_v42  ;;  %v923_v7 = vld [vmem:[#allocation2] sm:$0xff] (!%p1385_p3)  ;;  %1426 = vmatprep.subr.bf16.mxu0 (!%p1385_p3), %v1683_v30  ;;  %1455 = vmatprep.subr.bf16.mxu1 (!%p1385_p3), %v1683_v30 }
 0x1a7   : > { %915 = vst [vmem:[#allocation2 + $0x20] sm:$0xff] %v907_v40  ;;  %v909_v47 = vadd.f32 %v899_v41, %v363_v38  ;;  %v924_v0 = vld [vmem:[#allocation2 + $0x8] sm:$0xff] (!%p1385_p3)  ;;  %v943_v17 = vadd.f32 (!%p1385_p3), %v936_v3, %v923_v7  ;;  %1427 = vmatpush3.bf16.msra.mxu0 (!%p1385_p3), %v1684_v33  ;;  %1463 = vmatpush3.bf16.msra.mxu1 (!%p1385_p3), %v1684_v33  ;;  %v1386_v38 = vld [vmem:[%s2278_s4] ss:$0 sm:$0xff] (!%p1385_p3) }
 0x1a8   : > { %916 = vst [vmem:[#allocation2 + $0x28] sm:$0xff] %v908_v45  ;;  %v910_v48 = vadd.f32 %v901_v46, %v364_v43  ;;  %v925_v8 = vld [vmem:[#allocation2 + $0x10] sm:$0xff] (!%p1385_p3)  ;;  %v944_v11 = vadd.f32 (!%p1385_p3), %v940_v4, %v924_v0 }
 0x1a9   : > { %917 = vst [vmem:[#allocation2 + $0x30] sm:$0xff] %v909_v47  ;;  %v926_v1 = vld [vmem:[#allocation2 + $0x18] sm:$0xff] (!%p1385_p3)  ;;  %v945_v18 = vadd.f32 (!%p1385_p3), %v936_v3, %v925_v8  ;;  %v951_v24 = vmax.f32 (!%p1385_p3), %v943_v17, 0.0 }
 0x1aa   : > { %918 = vst [vmem:[#allocation2 + $0x38] sm:$0xff] %v910_v48  ;;  %v946_v12 = vadd.f32 (!%p1385_p3), %v940_v4, %v926_v1  ;;  %v952_v19 = vmax.f32 (!%p1385_p3), %v944_v11, 0.0 }
 0x1ab   : > { %v953_v25 = vmax.f32 %v945_v18, 0.0  ;;  %959 = vst [vmem:[#allocation9] sm:$0xff] %v951_v24 }
 0x1ac   : > { %v954_v20 = vmax.f32 %v946_v12, 0.0  ;;  %960 = vst [vmem:[#allocation9 + $0x8] sm:$0xff] %v952_v19 }
 0x1ad   : > { %961 = vst [vmem:[#allocation9 + $0x10] sm:$0xff] %v953_v25  ;;  %v967_v34 = vpack.c.bf16 %v953_v25, %v951_v24 }
 0x1ae   : > { %v927_v9 = vld [vmem:[#allocation2 + $0x20] sm:$0xff]  ;;  %962 = vst [vmem:[#allocation9 + $0x18] sm:$0xff] %v954_v20  ;;  %v968_v28 = vpack.c.bf16 %v954_v20, %v952_v19 }
 0x1af   : > { %v928_v5 = vld [vmem:[#allocation2 + $0x28] sm:$0xff]  ;;  %v947_v22 = vadd.f32 %v936_v3, %v927_v9 }
 0x1b0   : > { %v948_v13 = vadd.f32 %v940_v4, %v928_v5  ;;  %v929_v14 = vld [vmem:[#allocation2 + $0x30] sm:$0xff]  ;;  %1138 = vmatprep.mubr.bf16.mxu0 %v968_v28 }
 0x1b1   : > { %v930_v6 = vld [vmem:[#allocation2 + $0x38] sm:$0xff]  ;;  %v949_v26 = vadd.f32 %v936_v3, %v929_v14  ;;  %v955_v29 = vmax.f32 %v947_v22, 0.0  ;;  %1139 = vmatmul.mubr.bf16.vlgmr.msra.gmra.mrb[0].mxu0 %v967_v34 }
 0x1b2   : > { %v950_v16 = vadd.f32 %v940_v4, %v930_v6  ;;  %v956_v21 = vmax.f32 %v948_v13, 0.0 }
 0x1b3   : > { %v957_v32 = vmax.f32 %v949_v26, 0.0  ;;  %963 = vst [vmem:[#allocation9 + $0x20] sm:$0xff] %v955_v29 }
 0x1b4   : > { %v958_v23 = vmax.f32 %v950_v16, 0.0  ;;  %964 = vst [vmem:[#allocation9 + $0x28] sm:$0xff] %v956_v21 }
 0x1b5   : > { %965 = vst [vmem:[#allocation9 + $0x30] sm:$0xff] %v957_v32  ;;  %v969_v35 = vpack.c.bf16 %v957_v32, %v955_v29 }
 0x1b6   : > { %966 = vst [vmem:[#allocation9 + $0x38] sm:$0xff] %v958_v23  ;;  %v970_v31 = vpack.c.bf16 %v958_v23, %v956_v21 }
 0x1b8   : > { %1146 = vmatprep.mubr.bf16.mxu1 %v970_v31 }
 0x1b9   : > { %1147 = vmatmul.mubr.bf16.vlgmr.msra.gmra.mrb[0].mxu1 %v969_v35 }
 0x284   : > { %v1428_v36 = vpop.f32.mrb[0].mxu0 }
 0x285   : > { %v1429_v39 = vpop.f32.mrb[1].mxu0 }
 0x286   : > { %v1430_v41 = vadd.f32 %v1429_v39, %v1428_v36  ;;  %v1431_v43 = vpop.f32.mrb[2].mxu0 }
 0x287   : > { %v1432_v45 = vpop.f32.mrb[3].mxu0 }
 0x288   : > { %v1141_v47 = vadd.f32 %v1430_v41, %v1386_v38  ;;  %v1433_v49 = vadd.f32 %v1432_v45, %v1431_v43 }
 0x28a   : > { %1155 = vst [vmem:[#allocation10] sm:$0xff] %v1141_v47  ;;  %v1144_v51 = vadd.f32 %v1433_v49, %v1386_v38 }
 0x28c   : > { %v1434_v37 = vpop.f32.mrb[0].mxu1  ;;  %1156 = vst [vmem:[#allocation10 + $0x8] sm:$0xff] %v1144_v51 }
 0x28d   : > { %v1435_v40 = vpop.f32.mrb[1].mxu1 }
 0x28e   : > { %v1436_v42 = vadd.f32 %v1435_v40, %v1434_v37  ;;  %v1437_v44 = vpop.f32.mrb[2].mxu1 }
 0x28f   : > { %v1438_v46 = vpop.f32.mrb[3].mxu1 }
 0x290   : > { %v1149_v48 = vadd.f32 %v1436_v42, %v1386_v38  ;;  %v1439_v50 = vadd.f32 %v1438_v46, %v1437_v44 }
 0x292   : > { %1157 = vst [vmem:[#allocation10 + $0x10] sm:$0xff] %v1149_v48  ;;  %v1152_v52 = vadd.f32 %v1439_v50, %v1386_v38 }
 0x294   : > { %1158 = vst [vmem:[#allocation10 + $0x18] sm:$0xff] %v1152_v52 }
 0x295 PF: > { %p1494_p6 = scmp.eq.s32.totalorder %s1974_s27, 1  ;;  %s1904_s19 = smov [#allocation9]  }
 0x296   : > { %s1169_s7 = sshll.u32 %s1904_s19, 4  ;;  %s1170_s7 = int_to_ptr.vmem [resolvable:$true] %s1169_s7 }
 0x297   : > { %s1773_s12 = scalar_lea.vmem %s1170_s7, 1024  ;;  %p1780_p0 = scmp.lt.s32.totalorder %s1170_s7, %s1170_s7 }
 0x298   : > { %p1774_p12 = scmp.ne.s32.totalorder %s1170_s7, %s1773_s12  ;;  %p1781_p4 = scmp.lt.s32.totalorder %s1773_s12, %s1773_s12 }
 0x29a   : > { %p1775_p1 = pnand %p1774_p12, %p1494_p6  ;;  %p1782_p7 = por %p1781_p4, %p1780_p0 }
 0x29c   : > { %p1776_p2 = pneg %p1775_p1 }
 0x29e   : > { %p1783_p9 = pnand %p1782_p7, %p1776_p2 }
 0x2a0   : > { %1786 = shalt.err (!%p1783_p9)
}
 0x2a1   : > { %s1787_s15 = scalar_lea.hbm %s2279_s5, 1024 }
 0x2a2   : > { %p1788_p11 = scmp.ne.s32.totalorder %s2279_s5, %s1787_s15  ;;  %p1793_p10 = scmp.lt.u32.totalorder %s1787_s15, %s2279_s5 }
 0x2a4   : > { %p1789_p5 = pnand %p1788_p11, %p1494_p6 }
 0x2a6   : > { %p1790_p8 = pneg %p1789_p5 }
 0x2a8   : > { %p1795_p13 = pnand %p1793_p10, %p1790_p8 }
 0x2aa   : > { %1798 = shalt.err (!%p1795_p13)
}
 0x2ab   : > { %s1905_s28 = smov 256   ;;  %s1906_s14 = smov 16  }
 0x2ac   : > { %1473 = dma.vmem_to_hbm [thread:$0]  (%p1494_p6), %s1170_s7, 1024, %s2279_s5, [#allocation5], %s1905_s28, %s1905_s28, %s1906_s14  }
 0x2ad   : > { %s1907_s10 = smov [#allocation10]  }
 0x2ae   : > { %s1185_s0 = sshll.u32 %s1907_s10, 4  ;;  %s1186_s0 = int_to_ptr.vmem [resolvable:$true] %s1185_s0 }
 0x2af   : > { %s1799_s11 = scalar_lea.vmem %s1186_s0, 512  ;;  %p1806_p2 = scmp.lt.s32.totalorder %s1186_s0, %s1186_s0 }
 0x2b0   : > { %p1800_p3 = scmp.ne.s32.totalorder %s1186_s0, %s1799_s11  ;;  %p1807_p0 = scmp.lt.s32.totalorder %s1799_s11, %s1799_s11 }
 0x2b2   : > { %p1801_p12 = pnand %p1800_p3, %p1494_p6  ;;  %p1808_p4 = por %p1807_p0, %p1806_p2 }
 0x2b4   : > { %p1802_p1 = pneg %p1801_p12 }
 0x2b6   : > { %p1809_p7 = pnand %p1808_p4, %p1802_p1 }
 0x2b8   : > { %1812 = shalt.err (!%p1809_p7)
}
 0x2b9   : > { %s1813_s30 = scalar_lea.hbm %s2280_s6, 512 }
 0x2ba   : > { %p1814_p9 = scmp.ne.s32.totalorder %s2280_s6, %s1813_s30  ;;  %p1819_p8 = scmp.lt.u32.totalorder %s1813_s30, %s2280_s6 }
 0x2bc   : > { %p1815_p11 = pnand %p1814_p9, %p1494_p6 }
 0x2be   : > { %p1816_p5 = pneg %p1815_p11 }
 0x2c0   : > { %p1821_p10 = pnand %p1819_p8, %p1816_p5 }
 0x2c2   : > { %1824 = shalt.err (!%p1821_p10)
}
 0x2c3   : > { %s1908_s3 = smov 128   ;;  %s1909_s21 = smov 8  }
 0x2c4   : > { %1475 = dma.vmem_to_hbm [thread:$0]  (%p1494_p6), %s1186_s0, 512, %s2280_s6, [#allocation11], %s1908_s3, %s1908_s3, %s1909_s21  }
 0x2c5   : > { %1862 = dma.done.wait (%p1494_p6), [#allocation5], 1024  }
 0x2c6   : > { %1864 = vsyncadd (%p1494_p6), [#allocation5], 4294966272 }
 0x2c7   : > { %1866 = dma.done.wait (%p1494_p6), [#allocation11], 512  }
 0x2c8   : > { %1868 = vsyncadd (%p1494_p6), [#allocation11], 4294966784 }
 0x2c9 PF: > { %s25_s26 = sadd.s32 1, %s1891_s26   ;;  %s2302_s20 = sld [smem:[#allocation18_spill]] }
 0x2ca   : > { %p22_p13 = scmp.ge.s32.totalorder %s25_s26, 4   ;;  %s2303_s9 = sld [smem:[#allocation17_spill]] }
 0x2cb   : > { %s2304_s21 = smov %s1875_s22  ;;  %s2305_s22 = smov %s1879_s23 }
 0x2cc   : > { %s2307_s24 = smov %s1887_s25  ;;  %24 = sbr.rel (!%p22_p13) target bundleno = 11 (0xb), region = 112 }
 0x2cf   : > { %s2306_s23 = smov %s2302_s20 }
 0x2d0   : > { %s2308_s25 = smov %s2303_s9 }
 0x2d3   :  { %1205 = vsyncpa [#allocation4], 1 }
 0x2d4   :  { %1207 = vsyncpa [#allocation4 + $0x1], 1 }
 0x2d5   :  { %1208 = vsyncpa [#allocation7], 1 }
 0x2d6   :  { %1210 = vsyncpa [#allocation7 + $0x1], 1 }
 0x2d7   :  { %1211 = vsyncpa [#allocation5], 1 }
 0x2d8   :  { %1213 = vsyncpa [#allocation5 + $0x1], 1 }
 0x2d9   :  { %1214 = vsyncpa [#allocation11], 1 }

</bundles_post_ra>
